<compile_context>
chip_gen: v6e
topology: v6e:2x2x1
jax: 0.10.0
libtpu: 0.0.40
codegen_flags: <defaults>
</compile_context>

<pallas_src>
import jax
import jax.numpy as jnp
from jax.experimental import pallas as pl
from jax.experimental.pallas import tpu as pltpu

HID = 32          # hid_dim
VOCAB = 128       # vocab_size == input_dim
NLAYERS = 2
T_MAX = 128       # fixed stack capacity (supports sequences up to 127 steps)
HEAD_PAD = 256    # fused head output width: [vt(128) | ot(32) | dt(1) | ut(1) | pad]
F32 = jnp.float32


# --------------------------------------------------------------------------- kernel

def controller_kernel(x_ref, w0_ref, b0_ref, w1_ref, b1_ref, wh_ref, bh_ref,
                      ot_ref, val_ref, stg_ref, rt_ref, h_ref, c_ref):
    k = pl.program_id(0)          # timestep
    t1 = k + 1                    # number of rows currently on the stack (t - 1)

    # ---- zero-init persistent state at the first step ----
    @pl.when(k == 0)
    def _init():
        val_ref[...] = jnp.zeros_like(val_ref)
        stg_ref[...] = jnp.zeros_like(stg_ref)
        rt_ref[...] = jnp.zeros_like(rt_ref)
        h_ref[...] = jnp.zeros_like(h_ref)
        c_ref[...] = jnp.zeros_like(c_ref)

    # ---- input augmentation: x + prev_read ----
    x_aug = x_ref[pl.ds(k, 1), :] + rt_ref[...]          # (1, V)

    # ---- 2-layer LSTM, single timestep; fused [x, h] @ [W_ih; W_hh] ----
    h0 = h_ref[0:1, :]
    c0 = c_ref[0:1, :]
    h1 = h_ref[1:2, :]
    c1 = c_ref[1:2, :]

    def cell(xh, c, w, b):
        gates = jnp.dot(xh, w, preferred_element_type=jnp.float32) + b   # (1, 4H)
        i = jax.nn.sigmoid(gates[:, 0:HID])
        f = jax.nn.sigmoid(gates[:, HID:2 * HID])
        g = jnp.tanh(gates[:, 2 * HID:3 * HID])
        o = jax.nn.sigmoid(gates[:, 3 * HID:4 * HID])
        c_new = f * c + i * g
        return o * jnp.tanh(c_new), c_new

    h0n, c0n = cell(jnp.concatenate([x_aug, h0], axis=1), c0, w0_ref[...], b0_ref[...])
    h1n, c1n = cell(jnp.concatenate([h0n, h1], axis=1), c1, w1_ref[...], b1_ref[...])

    h_ref[0:1, :] = h0n
    h_ref[1:2, :] = h1n
    c_ref[0:1, :] = c0n
    c_ref[1:2, :] = c1n

    # ---- fused heads: single (1,H)@(H,256) matmul -> [vt | ot | dt | ut | pad] ----
    head = jnp.dot(h1n, wh_ref[...], preferred_element_type=jnp.float32) + bh_ref[...]
    vt = jnp.tanh(head[:, 0:VOCAB])                                    # (1, V)
    ot = jnp.tanh(head[:, VOCAB:VOCAB + HID])                          # (1, H)
    dt = jax.nn.sigmoid(head[:, VOCAB + HID:VOCAB + HID + 1])          # (1, 1)
    ut = jax.nn.sigmoid(head[:, VOCAB + HID + 1:VOCAB + HID + 2])      # (1, 1)

    ot_ref[pl.ds(k, 1), :] = ot
    val_ref[pl.ds(t1, 1), :] = vt          # "Val = cat(prev_Val, vt)" -> write row t-1

    # ---- NN-stack POP phase (serial, data-dependent recurrence on u) ----
    lane = jax.lax.broadcasted_iota(jnp.int32, (1, T_MAX), 1)

    def pop_body(m, carry):
        u, row = carry
        i = t1 - 1 - m                                         # t_1-1 ... 0
        mask = lane == i
        p_i = jnp.sum(jnp.where(mask, row, 0.0), axis=1, keepdims=True)   # prev_stg[i]
        s_i = jnp.maximum(0.0, p_i - jnp.maximum(0.0, u))
        return u - s_i, jnp.where(mask, s_i, row)

    _, row = jax.lax.fori_loop(0, t1, pop_body, (ut, stg_ref[...]))
    row = jnp.where(lane == t1, dt, row)                       # stg[t-1] = dt
    stg_ref[...] = row                                         # single lane-dense store

    # ---- NN-stack READ phase (vectorized) ----
    # rest_i = sum_{j>i} stg[j]  (reverse-exclusive cumsum via triangular matmul)
    ri = jax.lax.broadcasted_iota(jnp.int32, (T_MAX, T_MAX), 0)
    ci = jax.lax.broadcasted_iota(jnp.int32, (T_MAX, T_MAX), 1)
    upper = (ri > ci).astype(jnp.float32)                      # (T_MAX, T_MAX)
    rest = jnp.dot(row, upper, preferred_element_type=jnp.float32)       # (1, T_MAX)
    coef = jnp.minimum(row, jnp.maximum(0.0, 1.0 - rest))      # zero for rows >= t
    rt_ref[...] = jnp.dot(coef, val_ref[...], preferred_element_type=jnp.float32)


# --------------------------------------------------------------------------- wrapper

def _full_spec(shape):
    n = len(shape)
    return pl.BlockSpec(shape, lambda k, n=n: (0,) * n)


def controller_rollout(params, x_seq):
    """Run T controller steps (starting from the None state) in one pallas_call."""
    T = x_seq.shape[0]
    assert T + 1 <= T_MAX

    # fused LSTM weights: [W_ih; W_hh] per layer
    w0 = jnp.concatenate([params["W_ih"][0], params["W_hh"][0]], axis=0)   # (V+H, 4H)
    w1 = jnp.concatenate([params["W_ih"][1], params["W_hh"][1]], axis=0)   # (2H, 4H)
    b0 = params["b"][0]
    b1 = params["b"][1]

    # fused head weights: columns [Wv | Wo | Wd | Wu | zero-pad]
    wh = jnp.zeros((HID, HEAD_PAD), F32)
    wh = wh.at[:, :VOCAB].set(params["Wv"])
    wh = wh.at[:, VOCAB:VOCAB + HID].set(params["Wo"])
    wh = wh.at[:, VOCAB + HID].set(params["Wd"])
    wh = wh.at[:, VOCAB + HID + 1].set(params["Wu"])
    bh = jnp.zeros((1, HEAD_PAD), F32)
    bh = bh.at[:, :VOCAB].set(params["Bv"])
    bh = bh.at[:, VOCAB:VOCAB + HID].set(params["Bo"])
    bh = bh.at[0, VOCAB + HID].set(params["Bd"])
    bh = bh.at[0, VOCAB + HID + 1].set(params["Bu"])

    inputs = (x_seq, w0, b0, w1, b1, wh, bh)
    out_shape = (
        jax.ShapeDtypeStruct((T, HID), F32),            # ot per step
        jax.ShapeDtypeStruct((T_MAX, VOCAB), F32),      # Val (rows 0..T valid)
        jax.ShapeDtypeStruct((1, T_MAX), F32),          # stg (entries 0..T valid)
        jax.ShapeDtypeStruct((1, VOCAB), F32),          # rt (prev_read for next step)
        jax.ShapeDtypeStruct((NLAYERS, HID), F32),      # final h
        jax.ShapeDtypeStruct((NLAYERS, HID), F32),      # final c
    )
    # TODO(synk): resuming from a non-None prev_State would need the initial
    # Val/stg/h/c/rt passed in (e.g. via input_output_aliases); the demo starts cold.
    return pl.pallas_call(
        controller_kernel,
        grid=(T,),
        out_shape=out_shape,
        in_specs=[_full_spec(a.shape) for a in inputs],
        out_specs=tuple(_full_spec(s.shape) for s in out_shape),
        compiler_params=pltpu.CompilerParams(dimension_semantics=("arbitrary",)),
    )(*inputs)


# --------------------------------------------------------------------------- pure-JAX reference

def _lstm_cell_ref(x, h, c, w_ih, w_hh, b):
    gates = x @ w_ih + h @ w_hh + b
    i = jax.nn.sigmoid(gates[:, 0:HID])
    f = jax.nn.sigmoid(gates[:, HID:2 * HID])
    g = jnp.tanh(gates[:, 2 * HID:3 * HID])
    o = jax.nn.sigmoid(gates[:, 3 * HID:4 * HID])
    c_new = f * c + i * g
    return o * jnp.tanh(c_new), c_new


def _nnstack_ref(prev_Val, prev_stg, dt, ut, vt):
    t_1, m = prev_Val.shape
    t = t_1 + 1
    stg = [None] * t
    stg[t - 1] = dt
    u = ut
    for i in range(t_1 - 1, -1, -1):
        stg[i] = jnp.maximum(0.0, prev_stg[i] - jnp.maximum(0.0, u))
        u = u - stg[i]
    Val = jnp.concatenate([prev_Val, vt], axis=0)
    rt = jnp.zeros((m,), F32)
    read = jnp.float32(1.0)
    for i in range(t - 1, -1, -1):
        coef = jnp.minimum(stg[i], jnp.maximum(0.0, read))
        rt = rt + coef * Val[i]
        read = read - stg[i]
    return Val, jnp.stack(stg), rt


def ref_forward(params, x, state):
    if state is None:
        prev_Val = jnp.zeros((1, VOCAB), F32)
        prev_stg = jnp.zeros((1,), F32)
        hs = [jnp.zeros((1, HID), F32) for _ in range(NLAYERS)]
        cs = [jnp.zeros((1, HID), F32) for _ in range(NLAYERS)]
        prev_read = jnp.zeros((VOCAB,), F32)
    else:
        (prev_Val, prev_stg), (hs, cs), prev_read = state

    h = (x + prev_read).reshape(1, VOCAB)
    new_hs, new_cs = [], []
    for l in range(NLAYERS):
        h, c = _lstm_cell_ref(h, hs[l], cs[l],
                              params["W_ih"][l], params["W_hh"][l], params["b"][l])
        new_hs.append(h)
        new_cs.append(c)

    dt = jax.nn.sigmoid(jnp.dot(h, params["Wd"]) + params["Bd"])[0]
    ut = jax.nn.sigmoid(jnp.dot(h, params["Wu"]) + params["Bu"])[0]
    vt = jnp.tanh(h @ params["Wv"] + params["Bv"])
    ot = jnp.tanh(h @ params["Wo"] + params["Bo"])

    Val, stg, rt = _nnstack_ref(prev_Val, prev_stg, dt, ut, vt)
    return ot, ((Val, stg), (new_hs, new_cs), rt)


# --------------------------------------------------------------------------- params

def init_params(key):
    ks = list(jax.random.split(key, 16))
    s = 0.1

    def nxt(shape):
        return s * jax.random.normal(ks.pop(0), shape, dtype=F32)

    W_ih, W_hh, b = [], [], []
    for l in range(NLAYERS):
        din = VOCAB if l == 0 else HID
        W_ih.append(nxt((din, 4 * HID)))
        W_hh.append(nxt((HID, 4 * HID)))
        b.append(nxt((1, 4 * HID)))
    return dict(W_ih=W_ih, W_hh=W_hh, b=b,
                Wd=nxt((HID,)), Bd=nxt(()),
                Wu=nxt((HID,)), Bu=nxt(()),
                Wv=nxt((HID, VOCAB)), Bv=nxt((1, VOCAB)),
                Wo=nxt((HID, HID)), Bo=nxt((1, HID)))


# --------------------------------------------------------------------------- main

if __name__ == "__main__":
    key = jax.random.PRNGKey(0)
    pkey, xkey = jax.random.split(key)
    params = init_params(pkey)

    T = 6
    x_seq = 0.5 * jax.random.normal(xkey, (T, VOCAB), dtype=F32)

    # fused Pallas rollout (one kernel launch for all T steps)
    ot_seq, Val, stg, rt, h_fin, c_fin = jax.jit(controller_rollout)(params, x_seq)
    jax.block_until_ready((ot_seq, Val, stg, rt, h_fin, c_fin))

    # pure-JAX per-step reference (same math, unfused)
    state = None
    ref_ots = []
    for k in range(T):
        o, state = ref_forward(params, x_seq[k], state)
        ref_ots.append(o)
    (rVal, rstg), (rhs, rcs), rrt = state
    ref_ot = jnp.concatenate(ref_ots, axis=0)       # (T, H)
    ref_h = jnp.concatenate(rhs, axis=0)            # (NLAYERS, H)
    ref_c = jnp.concatenate(rcs, axis=0)

    def _chk(a, b, name):
        assert jnp.allclose(a, b, atol=2e-3, rtol=2e-3), \
            f"mismatch in {name}: max abs diff {jnp.max(jnp.abs(a - b))}"

    _chk(ot_seq, ref_ot, "ot")
    _chk(Val[:T + 1], rVal, "Val")
    _chk(stg[0, :T + 1], rstg, "stg")
    _chk(rt[0], rrt, "rt")
    _chk(h_fin, ref_h, "h")
    _chk(c_fin, ref_c, "c")

    print("KERNEL_OK")
</pallas_src>

<mosaic_0001>
module attributes {stable_mosaic.version = 11 : i64} {
  func.func @controller_kernel(%arg0: i32, %arg1: memref<6x128xf32, #tpu.memory_space<vmem>>, %arg2: memref<160x128xf32, #tpu.memory_space<vmem>>, %arg3: memref<1x128xf32, #tpu.memory_space<vmem>>, %arg4: memref<64x128xf32, #tpu.memory_space<vmem>>, %arg5: memref<1x128xf32, #tpu.memory_space<vmem>>, %arg6: memref<32x256xf32, #tpu.memory_space<vmem>>, %arg7: memref<1x256xf32, #tpu.memory_space<vmem>>, %arg8: memref<6x32xf32, #tpu.memory_space<vmem>>, %arg9: memref<128x128xf32, #tpu.memory_space<vmem>>, %arg10: memref<1x128xf32, #tpu.memory_space<vmem>>, %arg11: memref<1x128xf32, #tpu.memory_space<vmem>>, %arg12: memref<2x32xf32, #tpu.memory_space<vmem>>, %arg13: memref<2x32xf32, #tpu.memory_space<vmem>>) attributes {dimension_semantics = [#tpu.dimension_semantics<arbitrary>], iteration_bounds = array<i64: 6>, scalar_prefetch = 0 : i64, scratch_operands = 0 : i64, tpu.core_type = #tpu.core_type<tc>, window_params = [{pipeline_mode = #tpu.pipeline_mode<synchronous>, transform_indices = @transform_0, window_bounds = array<i64: 6, 128>}, {pipeline_mode = #tpu.pipeline_mode<synchronous>, transform_indices = @transform_1, window_bounds = array<i64: 160, 128>}, {pipeline_mode = #tpu.pipeline_mode<synchronous>, transform_indices = @transform_2, window_bounds = array<i64: 1, 128>}, {pipeline_mode = #tpu.pipeline_mode<synchronous>, transform_indices = @transform_3, window_bounds = array<i64: 64, 128>}, {pipeline_mode = #tpu.pipeline_mode<synchronous>, transform_indices = @transform_4, window_bounds = array<i64: 1, 128>}, {pipeline_mode = #tpu.pipeline_mode<synchronous>, transform_indices = @transform_5, window_bounds = array<i64: 32, 256>}, {pipeline_mode = #tpu.pipeline_mode<synchronous>, transform_indices = @transform_6, window_bounds = array<i64: 1, 256>}, {pipeline_mode = #tpu.pipeline_mode<synchronous>, transform_indices = @transform_7, window_bounds = array<i64: 6, 32>}, {pipeline_mode = #tpu.pipeline_mode<synchronous>, transform_indices = @transform_8, window_bounds = array<i64: 128, 128>}, {pipeline_mode = #tpu.pipeline_mode<synchronous>, transform_indices = @transform_9, window_bounds = array<i64: 1, 128>}, {pipeline_mode = #tpu.pipeline_mode<synchronous>, transform_indices = @transform_10, window_bounds = array<i64: 1, 128>}, {pipeline_mode = #tpu.pipeline_mode<synchronous>, transform_indices = @transform_11, window_bounds = array<i64: 2, 32>}, {pipeline_mode = #tpu.pipeline_mode<synchronous>, transform_indices = @transform_12, window_bounds = array<i64: 2, 32>}]} {
    %c1_i32 = arith.constant 1 : i32
    %0 = arith.addi %arg0, %c1_i32 : i32
    %c0_i32 = arith.constant 0 : i32
    %1 = arith.cmpi eq, %arg0, %c0_i32 : i32
    %2 = arith.extui %1 : i1 to i32
    %c0_i32_0 = arith.constant 0 : i32
    %3 = arith.cmpi ne, %2, %c0_i32_0 : i32
    scf.if %3 {
      %cst_56 = arith.constant 0.000000e+00 : f32
      %125 = vector.broadcast %cst_56 : f32 to vector<128x128xf32>
      %c0_57 = arith.constant 0 : index
      %c0_58 = arith.constant 0 : index
      %126 = vector.load %arg9[%c0_57, %c0_58] : memref<128x128xf32, #tpu.memory_space<vmem>>, vector<128x128xf32>
      tpu.vector_store %arg9[%c0_57, %c0_58], %125 {strides = array<i32>} : memref<128x128xf32, #tpu.memory_space<vmem>>, vector<128x128xf32>,
      %cst_59 = arith.constant 0.000000e+00 : f32
      %127 = vector.broadcast %cst_59 : f32 to vector<1x128xf32>
      %c0_60 = arith.constant 0 : index
      %c0_61 = arith.constant 0 : index
      %128 = vector.load %arg10[%c0_60, %c0_61] : memref<1x128xf32, #tpu.memory_space<vmem>>, vector<1x128xf32>
      tpu.vector_store %arg10[%c0_60, %c0_61], %127 {strides = array<i32>} : memref<1x128xf32, #tpu.memory_space<vmem>>, vector<1x128xf32>,
      %cst_62 = arith.constant 0.000000e+00 : f32
      %129 = vector.broadcast %cst_62 : f32 to vector<1x128xf32>
      %c0_63 = arith.constant 0 : index
      %c0_64 = arith.constant 0 : index
      %130 = vector.load %arg11[%c0_63, %c0_64] : memref<1x128xf32, #tpu.memory_space<vmem>>, vector<1x128xf32>
      tpu.vector_store %arg11[%c0_63, %c0_64], %129 {strides = array<i32>} : memref<1x128xf32, #tpu.memory_space<vmem>>, vector<1x128xf32>,
      %cst_65 = arith.constant 0.000000e+00 : f32
      %131 = vector.broadcast %cst_65 : f32 to vector<2x32xf32>
      %c0_66 = arith.constant 0 : index
      %c0_67 = arith.constant 0 : index
      %132 = vector.load %arg12[%c0_66, %c0_67] : memref<2x32xf32, #tpu.memory_space<vmem>>, vector<2x32xf32>
      tpu.vector_store %arg12[%c0_66, %c0_67], %131 {strides = array<i32>} : memref<2x32xf32, #tpu.memory_space<vmem>>, vector<2x32xf32>,
      %cst_68 = arith.constant 0.000000e+00 : f32
      %133 = vector.broadcast %cst_68 : f32 to vector<2x32xf32>
      %c0_69 = arith.constant 0 : index
      %c0_70 = arith.constant 0 : index
      %134 = vector.load %arg13[%c0_69, %c0_70] : memref<2x32xf32, #tpu.memory_space<vmem>>, vector<2x32xf32>
      tpu.vector_store %arg13[%c0_69, %c0_70], %133 {strides = array<i32>} : memref<2x32xf32, #tpu.memory_space<vmem>>, vector<2x32xf32>,
    } else {
    }
    %4 = arith.index_cast %arg0 : i32 to index
    %c0 = arith.constant 0 : index
    %5 = vector.load %arg1[%4, %c0] : memref<6x128xf32, #tpu.memory_space<vmem>>, vector<1x128xf32>
    %c0_1 = arith.constant 0 : index
    %c0_2 = arith.constant 0 : index
    %6 = vector.load %arg11[%c0_1, %c0_2] : memref<1x128xf32, #tpu.memory_space<vmem>>, vector<1x128xf32>
    %7 = arith.addf %5, %6 : vector<1x128xf32>
    %c0_3 = arith.constant 0 : index
    %c0_4 = arith.constant 0 : index
    %8 = vector.load %arg12[%c0_3, %c0_4] : memref<2x32xf32, #tpu.memory_space<vmem>>, vector<1x32xf32>
    %c0_5 = arith.constant 0 : index
    %c0_6 = arith.constant 0 : index
    %9 = vector.load %arg13[%c0_5, %c0_6] : memref<2x32xf32, #tpu.memory_space<vmem>>, vector<1x32xf32>
    %c1 = arith.constant 1 : index
    %c0_7 = arith.constant 0 : index
    %10 = vector.load %arg12[%c1, %c0_7] : memref<2x32xf32, #tpu.memory_space<vmem>>, vector<1x32xf32>
    %c1_8 = arith.constant 1 : index
    %c0_9 = arith.constant 0 : index
    %11 = vector.load %arg13[%c1_8, %c0_9] : memref<2x32xf32, #tpu.memory_space<vmem>>, vector<1x32xf32>
    %12 = tpu.concatenate %7, %8 in 1 : vector<1x128xf32>, vector<1x32xf32> -> vector<1x160xf32>
    %c0_10 = arith.constant 0 : index
    %c0_11 = arith.constant 0 : index
    %13 = vector.load %arg2[%c0_10, %c0_11] : memref<160x128xf32, #tpu.memory_space<vmem>>, vector<160x128xf32>
    %c0_12 = arith.constant 0 : index
    %c0_13 = arith.constant 0 : index
    %14 = vector.load %arg3[%c0_12, %c0_13] : memref<1x128xf32, #tpu.memory_space<vmem>>, vector<1x128xf32>
    %cst = arith.constant dense<0.000000e+00> : vector<1x128xf32>
    %15 = tpu.matmul %12, %13, %cst {dimension_numbers = #tpu.dot_dimension_numbers<[1], [0], [0], [1], [0, 0, 1, 1], [], []>} : vector<1x160xf32>, vector<160x128xf32>, vector<1x128xf32> -> vector<1x128xf32>
    %16 = arith.addf %15, %14 : vector<1x128xf32>
    %17 = vector.extract_strided_slice %16 {offsets = [0, 0], sizes = [1, 32], strides = [1, 1]} : vector<1x128xf32> to vector<1x32xf32>
    %18 = arith.negf %17 : vector<1x32xf32>
    %19 = math.exp %18 : vector<1x32xf32>
    %cst_14 = arith.constant 1.000000e+00 : f32
    %20 = vector.broadcast %cst_14 : f32 to vector<1x32xf32>
    %21 = arith.addf %20, %19 : vector<1x32xf32>
    %22 = arith.divf %20, %21 : vector<1x32xf32>
    %23 = vector.extract_strided_slice %16 {offsets = [0, 32], sizes = [1, 32], strides = [1, 1]} : vector<1x128xf32> to vector<1x32xf32>
    %24 = arith.negf %23 : vector<1x32xf32>
    %25 = math.exp %24 : vector<1x32xf32>
    %cst_15 = arith.constant 1.000000e+00 : f32
    %26 = vector.broadcast %cst_15 : f32 to vector<1x32xf32>
    %27 = arith.addf %26, %25 : vector<1x32xf32>
    %28 = arith.divf %26, %27 : vector<1x32xf32>
    %29 = vector.extract_strided_slice %16 {offsets = [0, 64], sizes = [1, 32], strides = [1, 1]} : vector<1x128xf32> to vector<1x32xf32>
    %30 = math.tanh %29 : vector<1x32xf32>
    %31 = vector.extract_strided_slice %16 {offsets = [0, 96], sizes = [1, 32], strides = [1, 1]} : vector<1x128xf32> to vector<1x32xf32>
    %32 = arith.negf %31 : vector<1x32xf32>
    %33 = math.exp %32 : vector<1x32xf32>
    %cst_16 = arith.constant 1.000000e+00 : f32
    %34 = vector.broadcast %cst_16 : f32 to vector<1x32xf32>
    %35 = arith.addf %34, %33 : vector<1x32xf32>
    %36 = arith.divf %34, %35 : vector<1x32xf32>
    %37 = arith.mulf %28, %9 : vector<1x32xf32>
    %38 = arith.mulf %22, %30 : vector<1x32xf32>
    %39 = arith.addf %37, %38 : vector<1x32xf32>
    %40 = math.tanh %39 : vector<1x32xf32>
    %41 = arith.mulf %36, %40 : vector<1x32xf32>
    %42 = tpu.concatenate %41, %10 in 1 : vector<1x32xf32>, vector<1x32xf32> -> vector<1x64xf32>
    %c0_17 = arith.constant 0 : index
    %c0_18 = arith.constant 0 : index
    %43 = vector.load %arg4[%c0_17, %c0_18] : memref<64x128xf32, #tpu.memory_space<vmem>>, vector<64x128xf32>
    %c0_19 = arith.constant 0 : index
    %c0_20 = arith.constant 0 : index
    %44 = vector.load %arg5[%c0_19, %c0_20] : memref<1x128xf32, #tpu.memory_space<vmem>>, vector<1x128xf32>
    %cst_21 = arith.constant dense<0.000000e+00> : vector<1x128xf32>
    %45 = tpu.matmul %42, %43, %cst_21 {dimension_numbers = #tpu.dot_dimension_numbers<[1], [0], [0], [1], [0, 0, 1, 1], [], []>} : vector<1x64xf32>, vector<64x128xf32>, vector<1x128xf32> -> vector<1x128xf32>
    %46 = arith.addf %45, %44 : vector<1x128xf32>
    %47 = vector.extract_strided_slice %46 {offsets = [0, 0], sizes = [1, 32], strides = [1, 1]} : vector<1x128xf32> to vector<1x32xf32>
    %48 = arith.negf %47 : vector<1x32xf32>
    %49 = math.exp %48 : vector<1x32xf32>
    %cst_22 = arith.constant 1.000000e+00 : f32
    %50 = vector.broadcast %cst_22 : f32 to vector<1x32xf32>
    %51 = arith.addf %50, %49 : vector<1x32xf32>
    %52 = arith.divf %50, %51 : vector<1x32xf32>
    %53 = vector.extract_strided_slice %46 {offsets = [0, 32], sizes = [1, 32], strides = [1, 1]} : vector<1x128xf32> to vector<1x32xf32>
    %54 = arith.negf %53 : vector<1x32xf32>
    %55 = math.exp %54 : vector<1x32xf32>
    %cst_23 = arith.constant 1.000000e+00 : f32
    %56 = vector.broadcast %cst_23 : f32 to vector<1x32xf32>
    %57 = arith.addf %56, %55 : vector<1x32xf32>
    %58 = arith.divf %56, %57 : vector<1x32xf32>
    %59 = vector.extract_strided_slice %46 {offsets = [0, 64], sizes = [1, 32], strides = [1, 1]} : vector<1x128xf32> to vector<1x32xf32>
    %60 = math.tanh %59 : vector<1x32xf32>
    %61 = vector.extract_strided_slice %46 {offsets = [0, 96], sizes = [1, 32], strides = [1, 1]} : vector<1x128xf32> to vector<1x32xf32>
    %62 = arith.negf %61 : vector<1x32xf32>
    %63 = math.exp %62 : vector<1x32xf32>
    %cst_24 = arith.constant 1.000000e+00 : f32
    %64 = vector.broadcast %cst_24 : f32 to vector<1x32xf32>
    %65 = arith.addf %64, %63 : vector<1x32xf32>
    %66 = arith.divf %64, %65 : vector<1x32xf32>
    %67 = arith.mulf %58, %11 : vector<1x32xf32>
    %68 = arith.mulf %52, %60 : vector<1x32xf32>
    %69 = arith.addf %67, %68 : vector<1x32xf32>
    %70 = math.tanh %69 : vector<1x32xf32>
    %71 = arith.mulf %66, %70 : vector<1x32xf32>
    %c0_25 = arith.constant 0 : index
    %c0_26 = arith.constant 0 : index
    %72 = vector.load %arg12[%c0_25, %c0_26] : memref<2x32xf32, #tpu.memory_space<vmem>>, vector<1x32xf32>
    tpu.vector_store %arg12[%c0_25, %c0_26], %41 {strides = array<i32>} : memref<2x32xf32, #tpu.memory_space<vmem>>, vector<1x32xf32>,
    %c1_27 = arith.constant 1 : index
    %c0_28 = arith.constant 0 : index
    %73 = vector.load %arg12[%c1_27, %c0_28] : memref<2x32xf32, #tpu.memory_space<vmem>>, vector<1x32xf32>
    tpu.vector_store %arg12[%c1_27, %c0_28], %71 {strides = array<i32>} : memref<2x32xf32, #tpu.memory_space<vmem>>, vector<1x32xf32>,
    %c0_29 = arith.constant 0 : index
    %c0_30 = arith.constant 0 : index
    %74 = vector.load %arg13[%c0_29, %c0_30] : memref<2x32xf32, #tpu.memory_space<vmem>>, vector<1x32xf32>
    tpu.vector_store %arg13[%c0_29, %c0_30], %39 {strides = array<i32>} : memref<2x32xf32, #tpu.memory_space<vmem>>, vector<1x32xf32>,
    %c1_31 = arith.constant 1 : index
    %c0_32 = arith.constant 0 : index
    %75 = vector.load %arg13[%c1_31, %c0_32] : memref<2x32xf32, #tpu.memory_space<vmem>>, vector<1x32xf32>
    tpu.vector_store %arg13[%c1_31, %c0_32], %69 {strides = array<i32>} : memref<2x32xf32, #tpu.memory_space<vmem>>, vector<1x32xf32>,
    %c0_33 = arith.constant 0 : index
    %c0_34 = arith.constant 0 : index
    %76 = vector.load %arg6[%c0_33, %c0_34] : memref<32x256xf32, #tpu.memory_space<vmem>>, vector<32x256xf32>
    %cst_35 = arith.constant dense<0.000000e+00> : vector<1x256xf32>
    %77 = tpu.matmul %71, %76, %cst_35 {dimension_numbers = #tpu.dot_dimension_numbers<[1], [0], [0], [1], [0, 0, 1, 1], [], []>} : vector<1x32xf32>, vector<32x256xf32>, vector<1x256xf32> -> vector<1x256xf32>
    %c0_36 = arith.constant 0 : index
    %c0_37 = arith.constant 0 : index
    %78 = vector.load %arg7[%c0_36, %c0_37] : memref<1x256xf32, #tpu.memory_space<vmem>>, vector<1x256xf32>
    %79 = arith.addf %77, %78 : vector<1x256xf32>
    %80 = vector.extract_strided_slice %79 {offsets = [0, 0], sizes = [1, 128], strides = [1, 1]} : vector<1x256xf32> to vector<1x128xf32>
    %81 = math.tanh %80 : vector<1x128xf32>
    %82 = vector.extract_strided_slice %79 {offsets = [0, 128], sizes = [1, 32], strides = [1, 1]} : vector<1x256xf32> to vector<1x32xf32>
    %83 = math.tanh %82 : vector<1x32xf32>
    %84 = vector.extract_strided_slice %79 {offsets = [0, 160], sizes = [1, 1], strides = [1, 1]} : vector<1x256xf32> to vector<1x1xf32>
    %85 = arith.negf %84 : vector<1x1xf32>
    %86 = math.exp %85 : vector<1x1xf32>
    %cst_38 = arith.constant 1.000000e+00 : f32
    %87 = vector.broadcast %cst_38 : f32 to vector<1x1xf32>
    %88 = arith.addf %87, %86 : vector<1x1xf32>
    %89 = arith.divf %87, %88 : vector<1x1xf32>
    %90 = vector.extract_strided_slice %79 {offsets = [0, 161], sizes = [1, 1], strides = [1, 1]} : vector<1x256xf32> to vector<1x1xf32>
    %91 = arith.negf %90 : vector<1x1xf32>
    %92 = math.exp %91 : vector<1x1xf32>
    %cst_39 = arith.constant 1.000000e+00 : f32
    %93 = vector.broadcast %cst_39 : f32 to vector<1x1xf32>
    %94 = arith.addf %93, %92 : vector<1x1xf32>
    %95 = arith.divf %93, %94 : vector<1x1xf32>
    %96 = arith.index_cast %arg0 : i32 to index
    %c0_40 = arith.constant 0 : index
    %97 = vector.load %arg8[%96, %c0_40] : memref<6x32xf32, #tpu.memory_space<vmem>>, vector<1x32xf32>
    tpu.vector_store %arg8[%96, %c0_40], %83 {strides = array<i32>} : memref<6x32xf32, #tpu.memory_space<vmem>>, vector<1x32xf32>,
    %98 = arith.index_cast %0 : i32 to index
    %c0_41 = arith.constant 0 : index
    %99 = vector.load %arg9[%98, %c0_41] : memref<128x128xf32, #tpu.memory_space<vmem>>, vector<1x128xf32>
    tpu.vector_store %arg9[%98, %c0_41], %81 {strides = array<i32>} : memref<128x128xf32, #tpu.memory_space<vmem>>, vector<1x128xf32>,
    %100 = tpu.iota {dimensions = array<i32: 1>} : vector<1x128xi32>
    %c0_42 = arith.constant 0 : index
    %c0_43 = arith.constant 0 : index
    %101 = vector.load %arg10[%c0_42, %c0_43] : memref<1x128xf32, #tpu.memory_space<vmem>>, vector<1x128xf32>
    %c0_i32_44 = arith.constant 0 : i32
    %102 = arith.subi %0, %c0_i32_44 : i32
    %103 = arith.addi %c0_i32_44, %102 : i32
    %c1_i32_45 = arith.constant 1 : i32
    %104:2 = scf.for %arg14 = %c0_i32_44 to %103 step %c1_i32_45 iter_args(%arg15 = %95, %arg16 = %101) -> (vector<1x1xf32>, vector<1x128xf32>)  : i32 {
      %c1_i32_56 = arith.constant 1 : i32
      %125 = arith.subi %0, %c1_i32_56 : i32
      %126 = arith.subi %125, %arg14 : i32
      %127 = vector.broadcast %126 : i32 to vector<1x128xi32>
      %128 = arith.cmpi eq, %100, %127 : vector<1x128xi32>
      %cst_57 = arith.constant 0.000000e+00 : f32
      %129 = vector.broadcast %cst_57 : f32 to vector<1x128xf32>
      %130 = arith.select %128, %arg16, %129 : vector<1x128xi1>, vector<1x128xf32>
      %cst_58 = arith.constant dense<0.000000e+00> : vector<1xf32>
      %131 = vector.multi_reduction <add>, %130, %cst_58 [1] : vector<1x128xf32> to vector<1xf32>
      %132 = vector.shape_cast %131 : vector<1xf32> to vector<1x1xf32>
      %cst_59 = arith.constant 0.000000e+00 : f32
      %133 = vector.broadcast %cst_59 : f32 to vector<1x1xf32>
      %134 = arith.maximumf %133, %arg15 : vector<1x1xf32>
      %135 = arith.subf %132, %134 : vector<1x1xf32>
      %cst_60 = arith.constant 0.000000e+00 : f32
      %136 = vector.broadcast %cst_60 : f32 to vector<1x1xf32>
      %137 = arith.maximumf %136, %135 : vector<1x1xf32>
      %138 = arith.subf %arg15, %137 : vector<1x1xf32>
      %139 = vector.shape_cast %137 : vector<1x1xf32> to vector<1x1xf32>
      %140 = vector.broadcast %139 : vector<1x1xf32> to vector<1x128xf32>
      %141 = arith.select %128, %140, %arg16 : vector<1x128xi1>, vector<1x128xf32>
      scf.yield %138, %141 : vector<1x1xf32>, vector<1x128xf32>
    }
    %105 = vector.broadcast %0 : i32 to vector<1x128xi32>
    %106 = arith.cmpi eq, %100, %105 : vector<1x128xi32>
    %107 = vector.shape_cast %89 : vector<1x1xf32> to vector<1x1xf32>
    %108 = vector.broadcast %107 : vector<1x1xf32> to vector<1x128xf32>
    %109 = arith.select %106, %108, %104#1 : vector<1x128xi1>, vector<1x128xf32>
    %c0_46 = arith.constant 0 : index
    %c0_47 = arith.constant 0 : index
    %110 = vector.load %arg10[%c0_46, %c0_47] : memref<1x128xf32, #tpu.memory_space<vmem>>, vector<1x128xf32>
    tpu.vector_store %arg10[%c0_46, %c0_47], %109 {strides = array<i32>} : memref<1x128xf32, #tpu.memory_space<vmem>>, vector<1x128xf32>,
    %111 = tpu.iota {dimensions = array<i32: 0>} : vector<128x128xi32>
    %112 = tpu.iota {dimensions = array<i32: 1>} : vector<128x128xi32>
    %113 = arith.cmpi sgt, %111, %112 : vector<128x128xi32>
    %114 = arith.extui %113 : vector<128x128xi1> to vector<128x128xi32>
    %115 = arith.sitofp %114 : vector<128x128xi32> to vector<128x128xf32>
    %cst_48 = arith.constant dense<0.000000e+00> : vector<1x128xf32>
    %116 = tpu.matmul %109, %115, %cst_48 {dimension_numbers = #tpu.dot_dimension_numbers<[1], [0], [0], [1], [0, 0, 1, 1], [], []>} : vector<1x128xf32>, vector<128x128xf32>, vector<1x128xf32> -> vector<1x128xf32>
    %cst_49 = arith.constant 1.000000e+00 : f32
    %117 = vector.broadcast %cst_49 : f32 to vector<1x128xf32>
    %118 = arith.subf %117, %116 : vector<1x128xf32>
    %cst_50 = arith.constant 0.000000e+00 : f32
    %119 = vector.broadcast %cst_50 : f32 to vector<1x128xf32>
    %120 = arith.maximumf %119, %118 : vector<1x128xf32>
    %121 = arith.minimumf %109, %120 : vector<1x128xf32>
    %c0_51 = arith.constant 0 : index
    %c0_52 = arith.constant 0 : index
    %122 = vector.load %arg9[%c0_51, %c0_52] : memref<128x128xf32, #tpu.memory_space<vmem>>, vector<128x128xf32>
    %cst_53 = arith.constant dense<0.000000e+00> : vector<1x128xf32>
    %123 = tpu.matmul %121, %122, %cst_53 {dimension_numbers = #tpu.dot_dimension_numbers<[1], [0], [0], [1], [0, 0, 1, 1], [], []>} : vector<1x128xf32>, vector<128x128xf32>, vector<1x128xf32> -> vector<1x128xf32>
    %c0_54 = arith.constant 0 : index
    %c0_55 = arith.constant 0 : index
    %124 = vector.load %arg11[%c0_54, %c0_55] : memref<1x128xf32, #tpu.memory_space<vmem>>, vector<1x128xf32>
    tpu.vector_store %arg11[%c0_54, %c0_55], %123 {strides = array<i32>} : memref<1x128xf32, #tpu.memory_space<vmem>>, vector<1x128xf32>,
    return
  }
  func.func @transform_0(%arg0: i32) -> (i32, i32) {
    %c0_i32 = arith.constant 0 : i32
    %c0_i32_0 = arith.constant 0 : i32
    %c0_i32_1 = arith.constant 0 : i32
    return %c0_i32, %c0_i32_0 : i32, i32
  }
  func.func @transform_1(%arg0: i32) -> (i32, i32) {
    %c0_i32 = arith.constant 0 : i32
    %c0_i32_0 = arith.constant 0 : i32
    %c0_i32_1 = arith.constant 0 : i32
    return %c0_i32, %c0_i32_0 : i32, i32
  }
  func.func @transform_2(%arg0: i32) -> (i32, i32) {
    %c0_i32 = arith.constant 0 : i32
    %c0_i32_0 = arith.constant 0 : i32
    %c0_i32_1 = arith.constant 0 : i32
    return %c0_i32, %c0_i32_0 : i32, i32
  }
  func.func @transform_3(%arg0: i32) -> (i32, i32) {
    %c0_i32 = arith.constant 0 : i32
    %c0_i32_0 = arith.constant 0 : i32
    %c0_i32_1 = arith.constant 0 : i32
    return %c0_i32, %c0_i32_0 : i32, i32
  }
  func.func @transform_4(%arg0: i32) -> (i32, i32) {
    %c0_i32 = arith.constant 0 : i32
    %c0_i32_0 = arith.constant 0 : i32
    %c0_i32_1 = arith.constant 0 : i32
    return %c0_i32, %c0_i32_0 : i32, i32
  }
  func.func @transform_5(%arg0: i32) -> (i32, i32) {
    %c0_i32 = arith.constant 0 : i32
    %c0_i32_0 = arith.constant 0 : i32
    %c0_i32_1 = arith.constant 0 : i32
    return %c0_i32, %c0_i32_0 : i32, i32
  }
  func.func @transform_6(%arg0: i32) -> (i32, i32) {
    %c0_i32 = arith.constant 0 : i32
    %c0_i32_0 = arith.constant 0 : i32
    %c0_i32_1 = arith.constant 0 : i32
    return %c0_i32, %c0_i32_0 : i32, i32
  }
  func.func @transform_7(%arg0: i32) -> (i32, i32) {
    %c0_i32 = arith.constant 0 : i32
    %c0_i32_0 = arith.constant 0 : i32
    %c0_i32_1 = arith.constant 0 : i32
    return %c0_i32, %c0_i32_0 : i32, i32
  }
  func.func @transform_8(%arg0: i32) -> (i32, i32) {
    %c0_i32 = arith.constant 0 : i32
    %c0_i32_0 = arith.constant 0 : i32
    %c0_i32_1 = arith.constant 0 : i32
    return %c0_i32, %c0_i32_0 : i32, i32
  }
  func.func @transform_9(%arg0: i32) -> (i32, i32) {
    %c0_i32 = arith.constant 0 : i32
    %c0_i32_0 = arith.constant 0 : i32
    %c0_i32_1 = arith.constant 0 : i32
    return %c0_i32, %c0_i32_0 : i32, i32
  }
  func.func @transform_10(%arg0: i32) -> (i32, i32) {
    %c0_i32 = arith.constant 0 : i32
    %c0_i32_0 = arith.constant 0 : i32
    %c0_i32_1 = arith.constant 0 : i32
    return %c0_i32, %c0_i32_0 : i32, i32
  }
  func.func @transform_11(%arg0: i32) -> (i32, i32) {
    %c0_i32 = arith.constant 0 : i32
    %c0_i32_0 = arith.constant 0 : i32
    %c0_i32_1 = arith.constant 0 : i32
    return %c0_i32, %c0_i32_0 : i32, i32
  }
  func.func @transform_12(%arg0: i32) -> (i32, i32) {
    %c0_i32 = arith.constant 0 : i32
    %c0_i32_0 = arith.constant 0 : i32
    %c0_i32_1 = arith.constant 0 : i32
    return %c0_i32, %c0_i32_0 : i32, i32
  }
}

</mosaic_0001>

<bundles_post_ra>
// kernel: controller_rollout.1
= control target key start
LH: loop header
LB: loop body
LE: loop exit
PB: predicated region body
PF: predicated region fallthrough
CT: control target
= control target key end

     0   :  { %18 = vsyncpa [#allocation3], 0  ;;  %s2144_s0 = inlined_call_operand.vmem [shape: f32[6,128], index: 0, kind: input, shape index: {}]   ;;  %s2145_s1 = inlined_call_operand.vmem [shape: f32[160,128], index: 1, kind: input, shape index: {}]   ;;  %s2146_s2 = inlined_call_operand.vmem [shape: f32[1,128], index: 2, kind: input, shape index: {}]   ;;  %s2147_s3 = inlined_call_operand.vmem [shape: f32[64,128], index: 3, kind: input, shape index: {}]   ;;  %s2148_s4 = inlined_call_operand.vmem [shape: f32[1,128], index: 4, kind: input, shape index: {}]   ;;  %s2149_s5 = inlined_call_operand.vmem [shape: f32[32,256], index: 5, kind: input, shape index: {}]   ;;  %s2150_s6 = inlined_call_operand.vmem [shape: f32[1,256], index: 6, kind: input, shape index: {}]   ;;  %s2151_s7 = inlined_call_operand.hbm [shape: f32[6,32], index: 7, kind: output, shape index: {0}]   ;;  %s2152_s8 = inlined_call_operand.hbm [shape: f32[128,128], index: 8, kind: output, shape index: {1}]   ;;  %s2153_s9 = inlined_call_operand.hbm [shape: f32[1,128], index: 9, kind: output, shape index: {2}]   ;;  %s2154_s10 = inlined_call_operand.hbm [shape: f32[1,128], index: 10, kind: output, shape index: {3}]   ;;  %s2155_s11 = inlined_call_operand.hbm [shape: f32[2,32], index: 11, kind: output, shape index: {4}]   ;;  %s2156_s12 = inlined_call_operand.hbm [shape: f32[2,32], index: 12, kind: output, shape index: {5}]  }
   0x1   :  { %19 = vsyncpa [#allocation5], 0 }
   0x2   :  { %20 = vsyncpa [#allocation8], 0 }
   0x3   :  { %21 = vsyncpa [#allocation11], 0  ;;  %s1790_s21 = smov 0  }
   0x4 LB: > { %s1796_s22 = sadd.s32 4294967295, %s1690_s21   ;;  %p1192_p0 = scmp.ge.s32.totalorder %s1690_s21, 1  ;;  %s1690_s21 = sphi %s1790_s21, %s27_s21  }
   0x5   : > { %p337_p1 = scmp.lt.s32.totalorder %s1690_s21, 7 }
   0x7   : > { %p338_p2 = pnand %p1192_p0, %p337_p1 }
   0x8   : > { %s1801_s23 = sadd.s32 (!%p338_p2), 1, %s1796_s22  ;;  %p1193_p3 = scmp.ne.s32.totalorder (!%p338_p2), %s1796_s22, 0 }
   0x9   : > { %341 = sbr.rel (%p338_p2) target bundleno = 2495 (0x9bf), region = 48 }
   0xe   : > { %373 = sbr.rel (%p1193_p3) target bundleno = 30 (0x1e), region = 52 }
  0x13   : > { %vm392_vm0 = vcmask 254976   ;;  %v1708_v0 = vmov 0.0  }
  0x14   : > { %374 = vst [vmem:[#allocation4] sm:$0xff] %v1708_v0  ;;  %375 = vst [vmem:[#allocation4 + $0x8] sm:$0xff] %v1708_v0 }
  0x15   : > { %376 = vst [vmem:[#allocation4 + $0x10] sm:$0xff] %v1708_v0  ;;  %377 = vst [vmem:[#allocation4 + $0x18] sm:$0xff] %v1708_v0 }
  0x16   : > { %378 = vst [vmem:[#allocation4 + $0x20] sm:$0xff] %v1708_v0  ;;  %379 = vst [vmem:[#allocation4 + $0x28] sm:$0xff] %v1708_v0 }
  0x17   : > { %380 = vst [vmem:[#allocation4 + $0x30] sm:$0xff] %v1708_v0  ;;  %381 = vst [vmem:[#allocation4 + $0x38] sm:$0xff] %v1708_v0 }
  0x18   : > { %382 = vst [vmem:[#allocation4 + $0x40] sm:$0xff] %v1708_v0  ;;  %383 = vst [vmem:[#allocation4 + $0x48] sm:$0xff] %v1708_v0 }
  0x19   : > { %384 = vst [vmem:[#allocation4 + $0x50] sm:$0xff] %v1708_v0  ;;  %385 = vst [vmem:[#allocation4 + $0x58] sm:$0xff] %v1708_v0 }
  0x1a   : > { %386 = vst [vmem:[#allocation4 + $0x60] sm:$0xff] %v1708_v0  ;;  %387 = vst [vmem:[#allocation4 + $0x68] sm:$0xff] %v1708_v0 }
  0x1b   : > { %388 = vst [vmem:[#allocation4 + $0x70] sm:$0xff] %v1708_v0  ;;  %389 = vst [vmem:[#allocation4 + $0x78] sm:$0xff] %v1708_v0 }
  0x1c   : > { %390 = vst [vmem:[#allocation6] sm:$0x1] %v1708_v0  ;;  %391 = vst [vmem:[#allocation7] sm:$0x1] %v1708_v0 }
  0x1d   : > { %393 = vst.msk [vmem:[#allocation9] sm:$0x3] %vm392_vm0, %v1708_v0  ;;  %394 = vst.msk [vmem:[#allocation10] sm:$0x3] %vm392_vm0, %v1708_v0 }
  0x1e PF: > { %v418_v1 = vld [vmem:[%s2145_s1 + $0x78] sm:$0xff]  ;;  %v1709_v2 = vmov 0.0   ;;  %v417_v3 = vld [vmem:[%s2145_s1 + $0x70] sm:$0xff]  ;;  %v416_v4 = vld [vmem:[%s2145_s1 + $0x68] sm:$0xff]  ;;  %vm424_vm1 = vcmask 261120   ;;  %s395_s30 = scalar_lea.vmem %s2144_s0, %s1796_s22  ;;  %s1710_s24 = smov 64  }
  0x1f   : > { %428 = vmatprep.subr.mxu0 %v1709_v2  ;;  %1300 = vmatprep.subr.mxu1 %v1709_v2  ;;  %v415_v5 = vld [vmem:[%s2145_s1 + $0x60] sm:$0xff]  ;;  %v414_v7 = vld [vmem:[%s2145_s1 + $0x58] sm:$0xff]  ;;  %v413_v8 = vld [vmem:[%s2145_s1 + $0x50] sm:$0xff]  ;;  %s1711_s25 = smov 32   ;;  %vm1712_vm2 = vmmov 0   ;;  %vm646_vm3 = vcmask 253952  }
  0x20   : > { %429 = vmatpush1.msra.mxu0 %v418_v1  ;;  %v412_v9 = vld [vmem:[%s2145_s1 + $0x48] sm:$0xff]  ;;  %v411_v10 = vld [vmem:[%s2145_s1 + $0x40] sm:$0xff]  ;;  %v410_v11 = vld [vmem:[%s2145_s1 + $0x38] sm:$0xff]  ;;  %1316 = vmatprep.mubr.msk.f32.mxu1 %vm1712_vm2, %v1709_v2  ;;  %vm544_vm4 = vcmask 523264   ;;  %s1713_s16 = smov 96   ;;  %s1253_s17 = scalar_lea.vmem [#allocation4], %s1690_s21 }
  0x21   : > { %430 = vmatprep.subr.mxu0 %v1709_v2  ;;  %v409_v12 = vld [vmem:[%s2145_s1 + $0x30] sm:$0xff]  ;;  %v408_v13 = vld [vmem:[%s2145_s1 + $0x28] sm:$0xff]  ;;  %v407_v14 = vld [vmem:[%s2145_s1 + $0x20] sm:$0xff]  ;;  %s1250_s18 = scalar_lea.vmem [#allocation2], %s1690_s21  ;;  %p1203_p4 = scmp.le.s32.totalorder %s1801_s23, 0 }
  0x22   : > { %431 = vmatpush1.msra.mxu0 %v417_v3  ;;  %v406_v15 = vld [vmem:[%s2145_s1 + $0x18] sm:$0xff]  ;;  %v405_v16 = vld [vmem:[%s2145_s1 + $0x10] sm:$0xff]  ;;  %v404_v17 = vld [vmem:[%s2145_s1 + $0x8] sm:$0xff]  ;;  %s1700_s19 = smov (!%p1203_p4), 0  }
  0x23   : > { %432 = vmatprep.subr.mxu0 %v1709_v2  ;;  %v403_v18 = vld [vmem:[%s2145_s1] sm:$0xff]  ;;  %v422_v19 = vld [vmem:[%s2145_s1 + $0x98] sm:$0xff]  ;;  %v421_v20 = vld [vmem:[%s2145_s1 + $0x90] sm:$0xff] }
  0x24   : > { %433 = vmatpush1.msra.mxu0 %v416_v4  ;;  %v399_v6 = vld [vmem:[#allocation9] sm:$0x1]  ;;  %v396_v21 = vld [vmem:[%s395_s30] sm:$0x1]  ;;  %v397_v22 = vld [vmem:[#allocation7] sm:$0x1] }
  0x25   : > { %434 = vmatprep.subr.mxu0 %v1709_v2  ;;  %1194 = vmatprep.mubr.msk.f32.mxu0 %vm424_vm1, %v399_v6  ;;  %v420_v23 = vld [vmem:[%s2145_s1 + $0x88] sm:$0xff]  ;;  %v419_v24 = vld [vmem:[%s2145_s1 + $0x80] sm:$0xff]  ;;  %v398_v25 = vadd.f32 %v397_v22, %v396_v21  ;;  %v542_v42 = vld [vmem:[%s2147_s3 + $0x38] sm:$0xff] }
  0x26   : > { %435 = vmatpush1.msra.mxu0 %v415_v5  ;;  %v423_v26 = vld [vmem:[%s2146_s2] sm:$0x1]  ;;  %v400_v31 = vld [vmem:[#allocation10] sm:$0x1]  ;;  %v541_v43 = vld [vmem:[%s2147_s3 + $0x30] sm:$0xff]  ;;  %1301 = vmatpush3.msra.mxu1 %v542_v42 }
  0x27   : > { %436 = vmatprep.subr.mxu0 %v1709_v2  ;;  %1302 = vmatprep.subr.mxu1 %v1709_v2  ;;  %v540_v44 = vld [vmem:[%s2147_s3 + $0x28] sm:$0xff]  ;;  %v539_v45 = vld [vmem:[%s2147_s3 + $0x20] sm:$0xff]  ;;  %v538_v46 = vld [vmem:[%s2147_s3 + $0x18] sm:$0xff] }
  0x28   : > { %437 = vmatpush1.msra.mxu0 %v414_v7  ;;  %1303 = vmatpush3.msra.mxu1 %v541_v43  ;;  %v537_v47 = vld [vmem:[%s2147_s3 + $0x10] sm:$0xff]  ;;  %v536_v49 = vld [vmem:[%s2147_s3 + $0x8] sm:$0xff]  ;;  %v535_v51 = vld [vmem:[%s2147_s3] sm:$0xff] }
  0x29   : > { %438 = vmatprep.subr.mxu0 %v1709_v2  ;;  %1304 = vmatprep.subr.mxu1 %v1709_v2  ;;  %v401_v50 = vld [vmem:[#allocation9 + $0x1] sm:$0x1]  ;;  %v402_v52 = vld [vmem:[#allocation10 + $0x1] sm:$0x1]  ;;  %v543_v58 = vld [vmem:[%s2148_s4] sm:$0x1] }
  0x2a   : > { %439 = vmatpush1.msra.mxu0 %v413_v8  ;;  %1305 = vmatpush3.msra.mxu1 %v540_v44 }
  0x2b   : > { %440 = vmatprep.subr.mxu0 %v1709_v2  ;;  %1306 = vmatprep.subr.mxu1 %v1709_v2 }
  0x2c   : > { %441 = vmatpush1.msra.mxu0 %v412_v9  ;;  %1307 = vmatpush3.msra.mxu1 %v539_v45 }
  0x2d   : > { %442 = vmatprep.subr.mxu0 %v1709_v2  ;;  %1308 = vmatprep.subr.mxu1 %v1709_v2 }
  0x2e   : > { %443 = vmatpush1.msra.mxu0 %v411_v10  ;;  %1309 = vmatpush3.msra.mxu1 %v538_v46  ;;  %v670_v10 = vld [vmem:[%s2149_s5 + $0x38] sm:$0xff] }
  0x2f   : > { %444 = vmatprep.subr.mxu0 %v1709_v2  ;;  %1310 = vmatprep.subr.mxu1 %v1709_v2 }
  0x30   : > { %445 = vmatpush1.msra.mxu0 %v410_v11  ;;  %1311 = vmatpush3.msra.mxu1 %v537_v47  ;;  %v669_v11 = vld [vmem:[%s2149_s5 + $0x30] sm:$0xff] }
  0x31   : > { %446 = vmatprep.subr.mxu0 %v1709_v2  ;;  %1312 = vmatprep.subr.mxu1 %v1709_v2 }
  0x32   : > { %447 = vmatpush1.msra.mxu0 %v409_v12  ;;  %1313 = vmatpush3.msra.mxu1 %v536_v49  ;;  %v668_v12 = vld [vmem:[%s2149_s5 + $0x28] sm:$0xff] }
  0x33   : > { %448 = vmatprep.subr.mxu0 %v1709_v2  ;;  %1314 = vmatprep.subr.mxu1 %v1709_v2 }
  0x34   : > { %449 = vmatpush1.msra.mxu0 %v408_v13  ;;  %1315 = vmatpush3.msra.mxu1 %v535_v51  ;;  %v667_v13 = vld [vmem:[%s2149_s5 + $0x20] sm:$0xff] }
  0x35   : > { %450 = vmatprep.subr.mxu0 %v1709_v2  ;;  %709 = vmatprep.subr.mxu1 %v670_v10 }
  0x36   : > { %451 = vmatpush1.msra.mxu0 %v407_v14  ;;  %v666_v14 = vld [vmem:[%s2149_s5 + $0x18] sm:$0xff] }
  0x37   : > { %452 = vmatprep.subr.mxu0 %v1709_v2 }
  0x38   : > { %453 = vmatpush1.msra.mxu0 %v406_v15  ;;  %v665_v15 = vld [vmem:[%s2149_s5 + $0x10] sm:$0xff] }
  0x39   : > { %454 = vmatprep.subr.mxu0 %v1709_v2 }
  0x3a   : > { %455 = vmatpush1.msra.mxu0 %v405_v16  ;;  %v664_v16 = vld [vmem:[%s2149_s5 + $0x8] sm:$0xff] }
  0x3b   : > { %456 = vmatprep.subr.mxu0 %v1709_v2 }
  0x3c   : > { %457 = vmatpush1.msra.mxu0 %v404_v17  ;;  %v663_v17 = vld [vmem:[%s2149_s5] sm:$0xff] }
  0x3d   : > { %458 = vmatprep.subr.mxu0 %v1709_v2 }
  0x3e   : > { %459 = vmatpush1.msra.mxu0 %v403_v18 }
  0x3f   : > { %484 = vmatprep.subr.mxu0 %v1709_v2 }
  0x40   : > { %485 = vmatpush2.msra.mxu0 %v422_v19 }
  0x41   : > { %486 = vmatprep.subr.mxu0 %v1709_v2 }
  0x42   : > { %487 = vmatpush2.msra.mxu0 %v421_v20 }
  0x43   : > { %488 = vmatprep.subr.mxu0 %v1709_v2 }
  0x44   : > { %489 = vmatpush2.msra.mxu0 %v420_v23 }
  0x45   : > { %490 = vmatprep.subr.mxu0 %v1709_v2 }
  0x46   : > { %491 = vmatpush2.msra.mxu0 %v419_v24  ;;  %v673_v24 = vlaneseq }
  0x47   : > { %493 = vmatmul.mubr.f32.vlgmr.msra.gmra.mxu0 %v398_v25 }
  0x48   : > { %v1977_v25 = vand.u32 127, %v673_v24 }
 0x107   : > { %v494_v27 = vpop.f32.mrf.mxu0 }
 0x108   : > { %v495_v28 = vadd.f32 %v494_v27, %v423_v26  ;;  %v770_v26 = vld [vmem:[#allocation6] sm:$0x1]   ;;  %v1979_v27 = vshrl.u32 %v673_v24, 7 }
 0x109   : > { %v496_v29 = vpop.f32.mrf.mxu0  ;;  %v1704_v43 = vmov %v770_v26  }
 0x10a   : > { %1482 = vtanh.f32 %v495_v28  ;;  %v1195_v32 = vmul.f32 -1.442695, %v495_v28  ;;  %v675_v28 = vsub.s32 0, %v1979_v27  ;;  %v671_v29 = vld [vmem:[%s2150_s6] sm:$0x3] }
 0x10c   : > { %1484 = vpow2.f32 %v1195_v32 }
 0x117   : > { %v1483_v30 = vpop.eup %1482 }
 0x118   : > { %511 = vrot.lane.b32.xlu0 %v1483_v30, %s1710_s24  ;;  %v679_v30 = vsub.s32 1, %v1979_v27 }
 0x119   : > { %v1485_v33 = vpop.eup %1484 }
 0x11a   : > { %v501_v34 = vadd.f32 1.0, %v1485_v33  ;;  %v680_v32 = vrot.slane %v671_v29, %v679_v30 }
 0x11c   : > { %506 = vrot.lane.b32.xlu0 %v400_v31, %s1711_s25  ;;  %1486 = vrcp.f32 %v501_v34  ;;  %v676_v31 = vrot.slane %v671_v29, %v675_v28 }
 0x129   : > { %v1487_v35 = vpop.eup %1486 }
 0x18a   : > { %v512_v36 = vpop.permute.xlu0 %511 }
 0x18b   : > { %v514_v37 = vmul.f32 %v1487_v35, %v512_v36 }
 0x18d   : > { %516 = vrot.lane.b32.xlu1 %v514_v37, %s1711_s25 }
 0x18e   : > { %v507_v38 = vpop.permute.xlu0 %506 }
 0x18f   : > { %v509_v39 = vmul.f32 %v1487_v35, %v507_v38 }
 0x1ff   : > { %v517_v40 = vpop.permute.xlu1 %516 }
 0x200   : > { %v1898_v41 = vadd.f32 %v517_v40, %v509_v39 }
 0x202   : > { %1488 = vtanh.f32 %v1898_v41 }
 0x20f   : > { %v1489_v48 = vpop.eup %1488 }
 0x210   : > { %522 = vrot.lane.b32.xlu1 %v1489_v48, %s1710_s24 }
 0x214   : > { %531 = vrot.lane.b32.xlu1 %v401_v50, %s1711_s25 }
 0x218   : > { %626 = vrot.lane.b32.xlu1 %v402_v52, %s1711_s25 }
 0x282   : > { %v523_v53 = vpop.permute.xlu1 %522 }
 0x283   : > { %v525_v54 = vmul.f32 %v1487_v35, %v523_v53 }
 0x285   : > { %527 = vrot.lane.b32.xlu0 %v525_v54, %s1711_s25 }
 0x286   : > { %v532_v55 = vpop.permute.xlu1 %531 }
 0x28a   : > { %v627_v6 = vpop.permute.xlu1 %626 }
 0x2f7   : > { %v528_v56 = vpop.permute.xlu0 %527 }
 0x2f8   : > { %647 = vst.msk [vmem:[#allocation9] sm:$0x1] %vm646_vm3, %v528_v56  ;;  %v534_v57 = vsel %vm424_vm1, %v528_v56, %v532_v55 }
 0x2f9   : > { %1317 = vmatmul.mubr.msk.f32.vlgmr.msra.gmra.mxu1 %vm544_vm4, %v534_v57 }
 0x2fa   : > { %749 = vmatprep.mubr.f32.mxu1 %v1709_v2  ;;  %710 = vmatpush1.msra.mxu1 %v669_v11 }
 0x2fb   : > { %711 = vmatprep.subr.mxu1 %v668_v12 }
 0x2fc   : > { %712 = vmatpush1.msra.mxu1 %v667_v13 }
 0x2fd   : > { %713 = vmatprep.subr.mxu1 %v666_v14 }
 0x2fe   : > { %714 = vmatpush1.msra.mxu1 %v665_v15 }
 0x2ff   : > { %715 = vmatprep.subr.mxu1 %v664_v16 }
 0x300   : > { %716 = vmatpush1.msra.mxu1 %v663_v17 }
 0x3b9   : > { %v614_v59 = vpop.f32.mrf.mxu1 }
 0x3ba   : > { %v615_v60 = vadd.f32 %v614_v59, %v543_v58 }
 0x3bb   : > { %v1318_v61 = vpop.f32.mrf.mxu1 }
 0x3bc   : > { %1490 = vtanh.f32 %v615_v60  ;;  %v1197_v63 = vmul.f32 -1.442695, %v615_v60 }
 0x3be   : > { %1492 = vpow2.f32 %v1197_v63 }
 0x3c9   : > { %v1491_v62 = vpop.eup %1490 }
 0x3ca   : > { %631 = vrot.lane.b32.xlu0 %v1491_v62, %s1710_s24 }
 0x3cb   : > { %v1493_v0 = vpop.eup %1492 }
 0x3cc   : > { %v621_v1 = vadd.f32 1.0, %v1493_v0 }
 0x3ce   : > { %1494 = vrcp.f32 %v621_v1 }
 0x3db   : > { %v1495_v3 = vpop.eup %1494 }
 0x3dc   : > { %v629_v7 = vmul.f32 %v1495_v3, %v627_v6 }
 0x43c   : > { %v632_v4 = vpop.permute.xlu0 %631 }
 0x43d   : > { %v634_v5 = vmul.f32 %v1495_v3, %v632_v4 }
 0x43f   : > { %636 = vrot.lane.b32.xlu0 %v634_v5, %s1711_s25 }
 0x4b1   : > { %v637_v8 = vpop.permute.xlu0 %636 }
 0x4b2   : > { %v639_v9 = vadd.f32 %v637_v8, %v629_v7 }
 0x4b4   : > { %1496 = vtanh.f32 %v639_v9 }
 0x4c1   : > { %v1497_v18 = vpop.eup %1496 }
 0x4c2   : > { %642 = vrot.lane.b32.xlu1 %v1497_v18, %s1710_s24 }
 0x4c6   : > { %654 = vrot.lane.b32.xlu1 %v1898_v41, %s1713_s16 }
 0x534   : > { %v643_v19 = vpop.permute.xlu1 %642 }
 0x535   : > { %v645_v20 = vmul.f32 %v1495_v3, %v643_v19 }
 0x537   : > { %649 = vrot.lane.b32.xlu0 %v645_v20, %s1711_s25 }
 0x538   : > { %v655_v21 = vpop.permute.xlu1 %654 }
 0x539   : > { %657 = vst.msk [vmem:[#allocation10] sm:$0x1] %vm646_vm3, %v655_v21 }
 0x53b   : > { %659 = vrot.lane.b32.xlu0 %v639_v9, %s1713_s16 }
 0x5a9   : > { %v650_v22 = vpop.permute.xlu0 %649 }
 0x5aa   : > { %652 = vst.msk [vmem:[#allocation9 + $0x1] sm:$0x1] %vm646_vm3, %v650_v22  ;;  %1198 = vmatmul.mubr.msk.f32.vlgmr.msra.gmra.mxu1 %vm424_vm1, %v650_v22 }
 0x5ad   : > { %v660_v23 = vpop.permute.xlu0 %659 }
 0x5ae   : > { %662 = vst.msk [vmem:[#allocation10 + $0x1] sm:$0x1] %vm646_vm3, %v660_v23 }
 0x66a   : > { %v751_v33 = vpop.f32.mrf.mxu1 }
 0x66b   : > { %v752_v34 = vadd.f32 %v751_v33, %v676_v31 }
 0x66c   : > { %v753_v35 = vpop.f32.mrf.mxu1 }
 0x66d   : > { %1498 = vtanh.f32 %v752_v34  ;;  %v754_v36 = vadd.f32 %v753_v35, %v680_v32 }
 0x66f   : > { %1500 = vtanh.f32 %v754_v36  ;;  %v1199_v37 = vmul.f32 -1.442695, %v754_v36 }
 0x671   : > { %1502 = vpow2.f32 %v1199_v37 }
 0x67a   : > { %v1499_v38 = vpop.eup %1498 }
 0x67b   : > { %1256 = vst [vmem:[%s1253_s17] sm:$0x1] %v1499_v38 }
 0x67c   : > { %v1501_v39 = vpop.eup %1500 }
 0x67d   : > { %1252 = vst.msk [vmem:[%s1250_s18 - $0x1] sm:$0x1] %vm646_vm3, %v1501_v39 }
 0x67e   : > { %v1503_v40 = vpop.eup %1502 }
 0x67f   : > { %v761_v41 = vadd.f32 1.0, %v1503_v40 }
 0x681   : > { %1504 = vrcp.f32 %v761_v41 }
 0x68a   : > { %1142 = sbr.rel (%p1203_p4) target bundleno = 1953 (0x7a1), region = 120 }
 0x68e   : > { %v1505_v42 = vpop.eup %1504  }
 0x68f   : > { %v1692_v44 = vmov %v770_v26   ;;  %v1696_v45 = vmov %v1505_v42  }
 0x690 LB: >> { %s779_s20 = ssub.s32 %s1796_s22, %s1702_s19  ;;  %vm783_vm5 = vcmask 1040384   ;;  %v1714_v49 = vmov 33   ;;  %v787_v50 = vmax.f32 %v1698_v45, 0.0  ;;  %s774_s19 = sadd.s32 1, %s1702_s19   ;;  %s1702_s19 = sphi %s1700_s19, %s774_s19   ;;  %v1698_v45 = vphi %v1696_v45, %v790_v45   ;;  %v1694_v44 = vphi %v1692_v44, %v1693_v44  }
 0x691   : >> { %v780_v46 = vstv %s779_s20  ;;  %1506 = vset.pattern.permute.xlu0 %v1714_v49  ;;  %p773_p5 = scmp.ge.s32.totalorder %s774_s19, %s1801_s23 }
 0x692   : >> { %vm781_vm6 = vcmp.eq.s32.totalorder %v1977_v25, %v780_v46 }
 0x693   : >> { %v782_v47 = vsel %vm781_vm6, %v1694_v44, 0.0 }
 0x694   : >> { %v784_v48 = vsel %vm783_vm5, %v782_v47, 0.0 }
 0x695   : >> { %785 = vadd.xlane.f32.xlu0 %v784_v48 }
 0x71e   : >> { %v786_v51 = vpop.xlane.xlu0 %785 }
 0x71f   : >> { %v788_v52 = vsub.f32 %v786_v51, %v787_v50 }
 0x721   : >> { %v789_v53 = vmax.f32 %v788_v52, 0.0 }
 0x723   : >> { %v790_v45 = vsub.f32 %v1698_v45, %v789_v53   ;;  %793 = vperm.xlu0 %1506, %v789_v53  }
 0x79c   : > { %776 = sbr.rel (!%p773_p5) target bundleno = 1680 (0x690), region = 126 }
 0x79e   : >> { %v794_v54 = vpop.permute.xlu0 %793 }
 0x79f   : >> { %v796_v55 = vsel %vm781_vm6, %v794_v54, %v1694_v44  }
 0x7a0   : >> { %v1693_v44 = vmov %v796_v55   ;;  %v1705_v43 = vmov (%p773_p5), %v796_v55  }
 0x7a1 PF: > { %1319 = vmatprep.subr.mxu1 %v1709_v2  ;;  %v822_v56 = vadd.s32 120, %v1979_v27  ;;  %v821_v57 = vadd.s32 112, %v1979_v27  ;;  %1351 = vmatprep.mubr.msk.f32.mxu1 %vm1712_vm2, %v1709_v2  ;;  %v959_v58 = vld [vmem:[#allocation4 + $0x78] sm:$0xff]  ;;  %v1715_v59 = vmov 32   ;;  %v820_v60 = vadd.s32 104, %v1979_v27  ;;  %v958_v62 = vld [vmem:[#allocation4 + $0x70] sm:$0xff]  ;;  %v1706_v43 = vphi %v1704_v43, %v1705_v43  }
 0x7a2   : > { %1507 = vset.pattern.permute.xlu0 %v1715_v59  ;;  %1354 = vmatprep.subr.mxu0 %v1709_v2  ;;  %v819_v61 = vadd.s32 96, %v1979_v27  ;;  %v1716_v63 = vmov 1.0   ;;  %v818_v0 = vadd.s32 88, %v1979_v27  ;;  %v957_v1 = vld [vmem:[#allocation4 + $0x68] sm:$0xff]  ;;  %v817_v3 = vadd.s32 80, %v1979_v27  ;;  %v956_v4 = vld [vmem:[#allocation4 + $0x60] sm:$0xff] }
 0x7a3   : > { %801 = vperm.xlu0 %1507, %v1505_v42   ;;  %vm838_vm7 = vcmp.gt.s32.totalorder %v822_v56, %v1977_v25  ;;  %vm837_vm8 = vcmp.gt.s32.totalorder %v821_v57, %v1977_v25  ;;  %1355 = vmatpush3.msra.mxu0 %v959_v58  ;;  %vm836_vm9 = vcmp.gt.s32.totalorder %v820_v60, %v1977_v25  ;;  %v816_v5 = vadd.s32 72, %v1979_v27  ;;  %v955_v6 = vld [vmem:[#allocation4 + $0x58] sm:$0xff]  ;;  %v954_v8 = vld [vmem:[#allocation4 + $0x50] sm:$0xff]  ;;  %v953_v10 = vld [vmem:[#allocation4 + $0x48] sm:$0xff]  ;;  %p1413_p6 = scmp.eq.s32.totalorder %s1796_s22, 5 }
 0x7a4   : > { %1320 = vmatpush3.msk.msra.mxu1 %vm838_vm7, %v1716_v63  ;;  %1356 = vmatprep.subr.mxu0 %v1709_v2  ;;  %vm835_vm10 = vcmp.gt.s32.totalorder %v819_v61, %v1977_v25  ;;  %vm834_vm11 = vcmp.gt.s32.totalorder %v818_v0, %v1977_v25  ;;  %vm833_vm12 = vcmp.gt.s32.totalorder %v817_v3, %v1977_v25  ;;  %v815_v7 = vadd.s32 64, %v1979_v27  ;;  %v952_v12 = vld [vmem:[#allocation4 + $0x40] sm:$0xff]  ;;  %v951_v14 = vld [vmem:[#allocation4 + $0x38] sm:$0xff]  ;;  %v950_v16 = vld [vmem:[#allocation4 + $0x30] sm:$0xff] }
 0x7a5   : > { %1321 = vmatprep.subr.mxu1 %v1709_v2  ;;  %1357 = vmatpush3.msra.mxu0 %v958_v62  ;;  %vm832_vm13 = vcmp.gt.s32.totalorder %v816_v5, %v1977_v25  ;;  %v814_v9 = vadd.s32 56, %v1979_v27  ;;  %v813_v11 = vadd.s32 48, %v1979_v27  ;;  %v812_v13 = vadd.s32 40, %v1979_v27  ;;  %v949_v18 = vld [vmem:[#allocation4 + $0x28] sm:$0xff]  ;;  %v948_v20 = vld [vmem:[#allocation4 + $0x20] sm:$0xff]  ;;  %v947_v26 = vld [vmem:[#allocation4 + $0x18] sm:$0xff] }
 0x7a6   : > { %1322 = vmatpush3.msk.msra.mxu1 %vm837_vm8, %v1716_v63  ;;  %1358 = vmatprep.subr.mxu0 %v1709_v2  ;;  %vm831_vm14 = vcmp.gt.s32.totalorder %v815_v7, %v1977_v25  ;;  %v811_v15 = vadd.s32 32, %v1979_v27  ;;  %v810_v17 = vadd.s32 24, %v1979_v27  ;;  %v809_v19 = vadd.s32 16, %v1979_v27  ;;  %v945_v28 = vld [vmem:[#allocation4 + $0x8] sm:$0xff] }
 0x7a7   : > { %1323 = vmatprep.subr.mxu1 %v1709_v2  ;;  %1359 = vmatpush3.msra.mxu0 %v957_v1  ;;  %vm830_vm15 = vcmp.gt.s32.totalorder %v814_v9, %v1977_v25  ;;  %vm829_vm0 = vcmp.gt.s32.totalorder %v813_v11, %v1977_v25  ;;  %vm828_vm1 = vcmp.gt.s32.totalorder %v812_v13, %v1977_v25  ;;  %v808_v21 = vadd.s32 8, %v1979_v27 }
 0x7a8   : > { %1324 = vmatpush3.msk.msra.mxu1 %vm836_vm9, %v1716_v63  ;;  %1360 = vmatprep.subr.mxu0 %v1709_v2  ;;  %vm827_vm3 = vcmp.gt.s32.totalorder %v811_v15, %v1977_v25  ;;  %vm826_vm4 = vcmp.gt.s32.totalorder %v810_v17, %v1977_v25  ;;  %vm825_vm5 = vcmp.gt.s32.totalorder %v809_v19, %v1977_v25  ;;  %v797_v22 = vstv %s1801_s23  ;;  %s1717_s23 = smov [#allocation4]  }
 0x7a9   : > { %1325 = vmatprep.subr.mxu1 %v1709_v2  ;;  %1361 = vmatpush3.msra.mxu0 %v956_v4  ;;  %vm824_vm6 = vcmp.gt.s32.totalorder %v808_v21, %v1977_v25  ;;  %vm823_vm7 = vcmp.gt.s32.totalorder %v1979_v27, %v1977_v25  ;;  %vm798_vm8 = vcmp.eq.s32.totalorder %v1977_v25, %v797_v22  ;;  %v946_v27 = vld [vmem:[#allocation4 + $0x10] sm:$0xff]  ;;  %v944_v25 = vld [vmem:[#allocation4] sm:$0xff]  ;;  %s1048_s26 = sshll.u32 %s1717_s23, 4  ;;  %s1049_s26 = int_to_ptr.vmem [resolvable:$true] %s1048_s26 }
 0x7aa   : > { %1326 = vmatpush3.msk.msra.mxu1 %vm835_vm10, %v1716_v63  ;;  %1362 = vmatprep.subr.mxu0 %v1709_v2  ;;  %s1508_s27 = scalar_lea.vmem %s1049_s26, 2048  ;;  %p1515_p10 = scmp.lt.s32.totalorder %s1049_s26, %s1049_s26 }
 0x7ab   : > { %1327 = vmatprep.subr.mxu1 %v1709_v2  ;;  %1363 = vmatpush3.msra.mxu0 %v955_v6  ;;  %p1509_p7 = scmp.ne.s32.totalorder %s1049_s26, %s1508_s27  ;;  %p1516_p11 = scmp.lt.s32.totalorder %s1508_s27, %s1508_s27 }
 0x7ac   : > { %1328 = vmatpush3.msk.msra.mxu1 %vm834_vm11, %v1716_v63  ;;  %1364 = vmatprep.subr.mxu0 %v1709_v2 }
 0x7ad   : > { %1329 = vmatprep.subr.mxu1 %v1709_v2  ;;  %1365 = vmatpush3.msra.mxu0 %v954_v8  ;;  %p1510_p8 = pnand %p1509_p7, %p1413_p6  ;;  %p1517_p12 = por %p1516_p11, %p1515_p10 }
 0x7ae   : > { %1330 = vmatpush3.msk.msra.mxu1 %vm833_vm12, %v1716_v63  ;;  %1366 = vmatprep.subr.mxu0 %v1709_v2 }
 0x7af   : > { %1331 = vmatprep.subr.mxu1 %v1709_v2  ;;  %1367 = vmatpush3.msra.mxu0 %v953_v10  ;;  %p1511_p9 = pneg %p1510_p8 }
 0x7b0   : > { %1332 = vmatpush3.msk.msra.mxu1 %vm832_vm13, %v1716_v63  ;;  %1368 = vmatprep.subr.mxu0 %v1709_v2 }
 0x7b1   : > { %1333 = vmatprep.subr.mxu1 %v1709_v2  ;;  %1369 = vmatpush3.msra.mxu0 %v952_v12  ;;  %p1518_p13 = pnand %p1517_p12, %p1511_p9 }
 0x7b2   : > { %1334 = vmatpush3.msk.msra.mxu1 %vm831_vm14, %v1716_v63  ;;  %1370 = vmatprep.subr.mxu0 %v1709_v2 }
 0x7b3   : > { %1335 = vmatprep.subr.mxu1 %v1709_v2  ;;  %1371 = vmatpush3.msra.mxu0 %v951_v14 }
 0x7b4   : > { %1336 = vmatpush3.msk.msra.mxu1 %vm830_vm15, %v1716_v63  ;;  %1372 = vmatprep.subr.mxu0 %v1709_v2 }
 0x7b5   : > { %1337 = vmatprep.subr.mxu1 %v1709_v2  ;;  %1373 = vmatpush3.msra.mxu0 %v950_v16 }
 0x7b6   : > { %1338 = vmatpush3.msk.msra.mxu1 %vm829_vm0, %v1716_v63  ;;  %1374 = vmatprep.subr.mxu0 %v1709_v2 }
 0x7b7   : > { %1339 = vmatprep.subr.mxu1 %v1709_v2  ;;  %1375 = vmatpush3.msra.mxu0 %v949_v18 }
 0x7b8   : > { %1340 = vmatpush3.msk.msra.mxu1 %vm828_vm1, %v1716_v63  ;;  %1376 = vmatprep.subr.mxu0 %v1709_v2 }
 0x7b9   : > { %1341 = vmatprep.subr.mxu1 %v1709_v2  ;;  %1377 = vmatpush3.msra.mxu0 %v948_v20 }
 0x7ba   : > { %1342 = vmatpush3.msk.msra.mxu1 %vm827_vm3, %v1716_v63  ;;  %1378 = vmatprep.subr.mxu0 %v1709_v2 }
 0x7bb   : > { %1343 = vmatprep.subr.mxu1 %v1709_v2  ;;  %1386 = vmatprep.mubr.msk.f32.mxu0 %vm1712_vm2, %v1709_v2 }
 0x7bc   : > { %1344 = vmatpush3.msk.msra.mxu1 %vm826_vm4, %v1716_v63  ;;  %1379 = vmatpush3.msra.mxu0 %v947_v26 }
 0x7bd   : > { %1345 = vmatprep.subr.mxu1 %v1709_v2  ;;  %1380 = vmatprep.subr.mxu0 %v1709_v2 }
 0x7be   : > { %1346 = vmatpush3.msk.msra.mxu1 %vm825_vm5, %v1716_v63  ;;  %1381 = vmatpush3.msra.mxu0 %v946_v27 }
 0x7bf   : > { %1347 = vmatprep.subr.mxu1 %v1709_v2  ;;  %1382 = vmatprep.subr.mxu0 %v1709_v2 }
 0x7c0   : > { %1348 = vmatpush3.msk.msra.mxu1 %vm824_vm6, %v1716_v63  ;;  %1383 = vmatpush3.msra.mxu0 %v945_v28 }
 0x7c1   : > { %1349 = vmatprep.subr.mxu1 %v1709_v2  ;;  %1384 = vmatprep.subr.mxu0 %v1709_v2 }
 0x7c2   : > { %1350 = vmatpush3.msk.msra.mxu1 %vm823_vm7, %v1716_v63  ;;  %1385 = vmatpush3.msra.mxu0 %v944_v25 }
 0x81e   : > { %v802_v23 = vpop.permute.xlu0 %801 }
 0x81f   : > { %v804_v24 = vsel %vm798_vm8, %v802_v23, %v1706_v43 }
 0x820   : > { %805 = vst [vmem:[#allocation6] sm:$0x1] %v804_v24  ;;  %1352 = vmatmul.mubr.f32.vlgmr.msra.gmra.mxu1 %v804_v24 }
 0x8e0   : > { %v937_v29 = vpop.f32.mrf.mxu1 }
 0x8e1   : > { %v941_v30 = vsub.f32 1.0, %v937_v29 }
 0x8e2   : > { %v1353_v31 = vpop.f32.mrf.mxu1 }
 0x8e3   : > { %v942_v32 = vmax.f32 %v941_v30, 0.0 }
 0x8e5   : > { %v943_v33 = vmin.f32 %v804_v24, %v942_v32 }
 0x8e7   : > { %1387 = vmatmul.mubr.f32.vlgmr.msra.gmra.mxu0 %v943_v33 }
 0x8e8   : > { %1521 = shalt.err (!%p1518_p13)
}
 0x8e9   : > { %s1718_s28 = smov 128   ;;  %s1719_s29 = smov 8  }
 0x8ea   : > { %1392 = dma.vmem_to_hbm [thread:$0]  (%p1413_p6), %s1049_s26, 2048, %s2152_s8, [#allocation5], %s1718_s28, %s1718_s28, %s1719_s29  }
 0x8eb   : > { %s1720_s14 = smov [#allocation2]   ;;  %s1721_s16 = smov [#allocation6]  }
 0x8ec   : > { %s1038_s15 = sshll.u32 %s1720_s14, 4  ;;  %s1062_s24 = sshll.u32 %s1721_s16, 4  ;;  %s1039_s15 = int_to_ptr.vmem [resolvable:$true] %s1038_s15  ;;  %s1063_s24 = int_to_ptr.vmem [resolvable:$true] %s1062_s24 }
 0x8ed   : > { %s1532_s25 = scalar_lea.vmem %s1039_s15, 128  ;;  %p1539_p3 = scmp.lt.s32.totalorder %s1039_s15, %s1039_s15 }
 0x8ee   : > { %p1533_p0 = scmp.ne.s32.totalorder %s1039_s15, %s1532_s25  ;;  %p1540_p4 = scmp.lt.s32.totalorder %s1532_s25, %s1532_s25 }
 0x8f0   : > { %p1534_p1 = pnand %p1533_p0, %p1413_p6  ;;  %p1541_p5 = por %p1540_p4, %p1539_p3 }
 0x8f2   : > { %p1535_p2 = pneg %p1534_p1 }
 0x8f4   : > { %p1542_p7 = pnand %p1541_p5, %p1535_p2 }
 0x8f6   : > { %1545 = shalt.err (!%p1542_p7)
}
 0x8f7   : > { %1390 = dma.vmem_to_hbm [thread:$0]  (%p1413_p6), %s1039_s15, 128, %s2151_s7, [#allocation3]  }
 0x8f8   : > { %s1556_s19 = scalar_lea.vmem %s1063_s24, 16  ;;  %s1562_s20 = scalar_lea.vmem %s1063_s24, 32 }
 0x8f9   : > { %p1557_p8 = scmp.ne.s32.totalorder %s1063_s24, %s1556_s19  ;;  %p1563_p11 = scmp.lt.s32.totalorder %s1063_s24, %s1063_s24 }
 0x8fa   : > { %p1564_p12 = scmp.lt.s32.totalorder %s1562_s20, %s1556_s19 }
 0x8fb   : > { %p1558_p9 = pnand %p1557_p8, %p1413_p6 }
 0x8fc   : > { %p1565_p13 = por %p1564_p12, %p1563_p11 }
 0x8fd   : > { %p1559_p10 = pneg %p1558_p9 }
 0x8ff   : > { %p1566_p0 = pnand %p1565_p13, %p1559_p10 }
 0x901   : > { %1569 = shalt.err (!%p1566_p0)
}
 0x902   : > { %1394 = dma.vmem_to_hbm [thread:$0]  (%p1413_p6), %s1063_s24, 16, %s2153_s9, [#allocation5]  }
 0x903   : > { %s1722_s27 = smov [#allocation10]  }
 0x904   : > { %s1095_s28 = sshll.u32 %s1722_s27, 4  ;;  %s1096_s28 = int_to_ptr.vmem [resolvable:$true] %s1095_s28 }
 0x905   : > { %s1580_s29 = scalar_lea.vmem %s1096_s28, 32  ;;  %p1587_p4 = scmp.lt.s32.totalorder %s1096_s28, %s1096_s28 }
 0x906   : > { %p1581_p1 = scmp.ne.s32.totalorder %s1096_s28, %s1580_s29  ;;  %p1588_p5 = scmp.lt.s32.totalorder %s1580_s29, %s1580_s29 }
 0x908   : > { %p1582_p2 = pnand %p1581_p1, %p1413_p6  ;;  %p1589_p7 = por %p1588_p5, %p1587_p4 }
 0x90a   : > { %p1583_p3 = pneg %p1582_p2 }
 0x90c   : > { %p1590_p8 = pnand %p1589_p7, %p1583_p3 }
 0x90e   : > { %1593 = shalt.err (!%p1590_p8)
}
 0x90f   : > { %1400 = dma.vmem_to_hbm [thread:$0]  (%p1413_p6), %s1096_s28, 32, %s2156_s12, [#allocation11]  }
 0x910   : > { %s1723_s14 = smov [#allocation7]   ;;  %s1724_s16 = smov [#allocation9]  }
 0x911   : > { %s1073_s15 = sshll.u32 %s1723_s14, 4  ;;  %s1084_s24 = sshll.u32 %s1724_s16, 4  ;;  %s1074_s15 = int_to_ptr.vmem [resolvable:$true] %s1073_s15  ;;  %s1085_s24 = int_to_ptr.vmem [resolvable:$true] %s1084_s24 }
 0x912   : > { %s1604_s25 = scalar_lea.vmem %s1074_s15, 16  ;;  %s1610_s17 = scalar_lea.vmem %s1074_s15, 32 }
 0x913   : > { %p1605_p9 = scmp.ne.s32.totalorder %s1074_s15, %s1604_s25  ;;  %p1611_p12 = scmp.lt.s32.totalorder %s1074_s15, %s1074_s15 }
 0x914   : > { %p1612_p13 = scmp.lt.s32.totalorder %s1610_s17, %s1604_s25 }
 0x915   : > { %p1606_p10 = pnand %p1605_p9, %p1413_p6 }
 0x916   : > { %p1613_p0 = por %p1612_p13, %p1611_p12 }
 0x917   : > { %p1607_p11 = pneg %p1606_p10 }
 0x919   : > { %p1614_p1 = pnand %p1613_p0, %p1607_p11 }
 0x9a7   : > { %v1026_v2 = vpop.f32.mrf.mxu0 }
 0x9a8   : > { %1030 = vst [vmem:[#allocation7] sm:$0x1] %v1026_v2 }
 0x9a9   : > { %v1388_v34 = vpop.f32.mrf.mxu0 }
 0x9aa   : > { %1617 = shalt.err (!%p1614_p1)
}
 0x9ab   : > { %1396 = dma.vmem_to_hbm [thread:$0]  (%p1413_p6), %s1074_s15, 16, %s2154_s10, [#allocation8]  }
 0x9ac   : > { %s1628_s20 = scalar_lea.vmem %s1085_s24, 32  ;;  %p1635_p5 = scmp.lt.s32.totalorder %s1085_s24, %s1085_s24 }
 0x9ad   : > { %p1629_p2 = scmp.ne.s32.totalorder %s1085_s24, %s1628_s20  ;;  %p1636_p7 = scmp.lt.s32.totalorder %s1628_s20, %s1628_s20 }
 0x9af   : > { %p1630_p3 = pnand %p1629_p2, %p1413_p6  ;;  %p1637_p8 = por %p1636_p7, %p1635_p5 }
 0x9b1   : > { %p1631_p4 = pneg %p1630_p3 }
 0x9b3   : > { %p1638_p9 = pnand %p1637_p8, %p1631_p4 }
 0x9b5   : > { %1641 = shalt.err (!%p1638_p9)
}
 0x9b6   : > { %1398 = dma.vmem_to_hbm [thread:$0]  (%p1413_p6), %s1085_s24, 32, %s2155_s11, [#allocation8]  }
 0x9b7   : > { %1673 = dma.done.wait (%p1413_p6), [#allocation3], 128  }
 0x9b8   : > { %1675 = vsyncadd (%p1413_p6), [#allocation3], 4294967168 }
 0x9b9   : > { %1677 = dma.done.wait (%p1413_p6), [#allocation5], 2064  }
 0x9ba   : > { %1679 = vsyncadd (%p1413_p6), [#allocation5], 4294965232 }
 0x9bb   : > { %1681 = dma.done.wait (%p1413_p6), [#allocation8], 48  }
 0x9bc   : > { %1683 = vsyncadd (%p1413_p6), [#allocation8], 4294967248 }
 0x9bd   : > { %1685 = dma.done.wait (%p1413_p6), [#allocation11], 32  }
 0x9be   : > { %1687 = vsyncadd (%p1413_p6), [#allocation11], 4294967264 }
 0x9bf PF: > { %s27_s21 = sadd.s32 1, %s1690_s21  }
 0x9c0   : > { %p24_p10 = scmp.ge.s32.totalorder %s27_s21, 8  }
 0x9c2   :  { %26 = sbr.rel (!%p24_p10) target bundleno = 4 (0x4), region = 137 }
 0x9c7   :  { %1128 = vsyncpa [#allocation3], 1 }
 0x9c8   :  { %1130 = vsyncpa [#allocation3 + $0x1], 1 }
 0x9c9   :  { %1131 = vsyncpa [#allocation5], 1 }
 0x9ca   :  { %1132 = vsyncpa [#allocation8], 1 }
 0x9cb   :  { %1133 = vsyncpa [#allocation11], 1 }

</bundles_post_ra>
